<compile_context>
chip_gen: v5e
topology: v5e:2x2
jax: 0.10.0
libtpu: 0.0.40
codegen_flags: <defaults>
</compile_context>

<pallas_src>
import functools

import numpy as np
import jax
import jax.numpy as jnp
from jax.experimental import pallas as pl
from jax.experimental.pallas import tpu as pltpu


def _round_up(x, m):
    return -(-x // m) * m


def _fused_kernel(x_ref, w_ref, b_ref, o_ref, *, activation, compute_dtype):
    """One output tile: act( x_tile @ w_tile + bias_tile ).

    x_ref : (bt, K)   input rows (full K -> no cross-step accumulator needed)
    w_ref : (K, tn)   weight tile, already stored in compute_dtype
    b_ref : (1, tn)   f32 bias tile
    o_ref : (bt, tn)  lane-dense output tile
    """
    x = x_ref[...]
    if x.dtype != compute_dtype:
        x = x.astype(compute_dtype)                       # per-tile cast for bf16 MXU path
    y = jnp.dot(x, w_ref[...], preferred_element_type=jnp.float32)
    y = y + b_ref[...].astype(jnp.float32)                # f32 epilogue
    if activation == "tanh":
        y = jnp.tanh(y)                                   # EUP slot, hidden under DMA
    else:
        y = jax.nn.sigmoid(y)
    o_ref[...] = y.astype(o_ref.dtype)


def _pick_batch_tile(batch, want):
    """Largest multiple-of-8 tile <= want that divides batch; else ragged tile."""
    if batch <= want:
        return batch
    want = max(8, want - want % 8)
    for cand in range(want, 7, -8):
        if batch % cand == 0:
            return cand
    return want   # ragged last tile handled via pl.cdiv (OOB output rows masked)


def _pick_n_tile(c_pad, want):
    """Lane tile: multiple of 128 that divides c_pad (c_pad is 128-aligned)."""
    want = max(128, want - want % 128)
    if c_pad <= want:
        return c_pad
    for cand in range(want, 127, -128):
        if c_pad % cand == 0:
            return cand
    return 128


def make_feature_transform_layer(mask, weights, biases, out_channels,
                                 activation="tanh", *,
                                 in_features=None,
                                 compute_dtype=jnp.float32,
                                 out_dtype=None,
                                 trim_output=True,
                                 batch_tile=256,
                                 n_tile=256,
                                 fold_gather=None):
    """Build the fused layer once (numpy packing, outside any traced path).

    mask      : list (one per block) of python ints indexing x's feature axis
    weights   : list of (F_b, C) arrays   (== torch Linear.weight.T)
    biases    : list of (1, C) or (C,) arrays
    Returns apply(x) computing concat_b act(x[:, mask[b]] @ W_b + b_b) along axis 1.
    """
    if activation not in ("tanh", "sigmoid"):
        raise ValueError("FeatureTransformLayer: inserted activation is not valid.")

    nb = len(mask)
    C = int(out_channels)
    widths = [len(idx) for idx in mask]
    sum_fb = sum(widths)
    out_width = nb * C
    c_pad = max(128, _round_up(out_width, 128))          # lane-dense output width

    if in_features is None:
        in_features = 1 + max(max(idx) for idx in mask)

    if fold_gather is None:
        # Fold the gather into the weight unless gathering shrinks x a lot.
        fold_gather = 2 * sum_fb >= in_features

    w_store_dtype = np.dtype(compute_dtype)

    # ---------- init-time parameter packing (numpy, happens exactly once) ----------
    b_np = np.zeros((1, c_pad), np.float32)
    for blk in range(nb):
        b_np[0, blk * C:(blk + 1) * C] = np.asarray(biases[blk], np.float32).reshape(-1)

    if fold_gather:
        # x @ W_full  with  W_full[f, blk*C + c] = sum_j [mask[blk][j] == f] * W_blk[j, c]
        w_np = np.zeros((in_features, c_pad), np.float32)
        for blk in range(nb):
            rows = np.asarray(mask[blk], np.int64)
            np.add.at(w_np[:, blk * C:(blk + 1) * C], rows,
                      np.asarray(weights[blk], np.float32))
        all_idx = None
        k_dim = in_features
    else:
        # x[:, concat(mask)] @ blockdiag(W_0..W_{nb-1})   (only when F >> sum_Fb)
        w_np = np.zeros((sum_fb, c_pad), np.float32)
        row = 0
        for blk in range(nb):
            fb = widths[blk]
            w_np[row:row + fb, blk * C:(blk + 1) * C] = np.asarray(weights[blk], np.float32)
            row += fb
        all_idx = jnp.asarray(np.concatenate([np.asarray(m, np.int32) for m in mask]))
        k_dim = sum_fb

    w_dev = jnp.asarray(w_np, w_store_dtype)   # bf16 pre-cast halves W HBM->VMEM bytes
    b_dev = jnp.asarray(b_np, jnp.float32)     # tiny; keep f32 for the epilogue

    kernel = functools.partial(_fused_kernel, activation=activation,
                               compute_dtype=w_store_dtype)

    def apply(x):
        if x.ndim != 2:
            raise ValueError("expected x of shape (batch, features)")
        B = x.shape[0]
        o_dtype = np.dtype(out_dtype) if out_dtype is not None else np.dtype(x.dtype)

        if fold_gather:
            if x.shape[1] != k_dim:
                raise ValueError("x feature dim does not match packed weight")
            x_in = x                               # no extra HBM pass over x
        else:
            # One gather for all blocks; cast once here so the kernel DMAs the
            # narrow dtype when compute_dtype is bf16.
            x_in = jnp.take(x, all_idx, axis=1).astype(w_store_dtype)

        bt = _pick_batch_tile(B, batch_tile)
        tn = _pick_n_tile(c_pad, n_tile)
        grid = (pl.cdiv(B, bt), c_pad // tn)

        # Scoped-VMEM budget from the actual (double-buffered) tiles + headroom.
        xb = x_in.dtype.itemsize
        wb = w_dev.dtype.itemsize
        ob = o_dtype.itemsize
        need = 2 * (bt * k_dim * xb + bt * tn * ob + k_dim * tn * wb + tn * 4)
        vmem_limit = int(min(64 * 2 ** 20, max(24 * 2 ** 20, 2 * need + 2 * 2 ** 20)))

        out = pl.pallas_call(
            kernel,
            out_shape=jax.ShapeDtypeStruct((B, c_pad), o_dtype),
            grid=grid,
            in_specs=[
                pl.BlockSpec((bt, k_dim), lambda i, j: (i, 0)),    # batch tile of x
                pl.BlockSpec((k_dim, tn), lambda i, j: (0, j)),    # weight N-tile
                pl.BlockSpec((1, tn), lambda i, j: (0, j)),        # bias N-tile
            ],
            out_specs=pl.BlockSpec((bt, tn), lambda i, j: (i, j)),  # lane-dense store
            compiler_params=pltpu.CompilerParams(
                dimension_semantics=("parallel", "parallel"),       # megacore on v7x
                vmem_limit_bytes=vmem_limit),
        )(x_in, w_dev, b_dev)

        if trim_output and c_pad != out_width:
            # Extra output pass; avoid by picking C so nb*C % 128 == 0 or by
            # letting the consumer accept the padded layout (trim_output=False).
            out = out[:, :out_width]
        return out

    return apply


# ----------------------------- reference & demo -----------------------------

def _reference(x, mask, weights, biases, activation):
    act = jnp.tanh if activation == "tanh" else jax.nn.sigmoid
    outs = []
    for blk, idx in enumerate(mask):
        xb = x[:, jnp.asarray(idx, dtype=jnp.int32)]
        outs.append(act(xb @ weights[blk] + biases[blk]))
    return jnp.concatenate(outs, axis=1)


def _make_params(key, mask, out_channels):
    weights, biases = [], []
    for idx in mask:
        key, kw, kb = jax.random.split(key, 3)
        fan_in = len(idx)
        w = jax.random.normal(kw, (fan_in, out_channels), jnp.float32) / jnp.sqrt(fan_in)
        b = 0.1 * jax.random.normal(kb, (1, out_channels), jnp.float32)
        weights.append(w)
        biases.append(b)
    return key, weights, biases


if __name__ == "__main__":
    key = jax.random.PRNGKey(0)
    C = 32

    # Config A: 4 blocks partitioning 16 features, tanh, f32 MXU, folded-gather
    # path; nb*C = 128 is already lane-aligned -> no padding, no trailing slice.
    mask_a = [[0, 1, 2, 3, 4, 5], [6, 7, 8, 9], [10, 11, 12], [13, 14, 15]]
    batch_a, feat_a = 16, 16
    key, kx = jax.random.split(key)
    x_a = jax.random.normal(kx, (batch_a, feat_a), jnp.float32)
    key, w_a, b_a = _make_params(key, mask_a, C)

    layer_a = make_feature_transform_layer(mask_a, w_a, b_a, C, "tanh",
                                           in_features=feat_a,
                                           compute_dtype=jnp.float32)
    out_a = jax.block_until_ready(layer_a(x_a))
    ref_a = _reference(x_a, mask_a, w_a, b_a, "tanh")
    assert out_a.shape == (batch_a, C * len(mask_a)), out_a.shape
    assert jnp.allclose(out_a, ref_a, atol=1e-4, rtol=1e-4), "cfg A mismatch vs reference"

    # Config B: 3 overlapping blocks over 24 features, sigmoid, bf16 MXU inputs
    # with f32 accumulation, exercising the gather + block-diagonal fallback and
    # the padded(128)->trimmed(96) output path.
    mask_b = [[0, 1, 2, 3, 4, 5, 6, 7],
              [4, 5, 6, 7, 8, 9, 10, 11, 12, 13],
              [14, 15, 16, 17, 18, 19, 20, 21, 22, 23]]
    batch_b, feat_b = 8, 24
    key, kx = jax.random.split(key)
    x_b = jax.random.normal(kx, (batch_b, feat_b), jnp.float32)
    key, w_b, b_b = _make_params(key, mask_b, C)

    layer_b = make_feature_transform_layer(mask_b, w_b, b_b, C, "sigmoid",
                                           in_features=feat_b,
                                           compute_dtype=jnp.bfloat16,
                                           fold_gather=False)
    out_b = jax.block_until_ready(layer_b(x_b))
    ref_b = _reference(x_b, mask_b, w_b, b_b, "sigmoid")
    assert out_b.shape == (batch_b, C * len(mask_b)), out_b.shape
    assert jnp.allclose(out_b, ref_b, atol=3e-2, rtol=3e-2), "cfg B mismatch vs reference"

    print("KERNEL_OK")
</pallas_src>

<mosaic_0001>
module attributes {stable_mosaic.version = 11 : i64} {
  func.func @_fused_kernel(%arg0: i32, %arg1: i32, %arg2: memref<16x16xf32, #tpu.memory_space<vmem>>, %arg3: memref<16x128xf32, #tpu.memory_space<vmem>>, %arg4: memref<1x128xf32, #tpu.memory_space<vmem>>, %arg5: memref<16x128xf32, #tpu.memory_space<vmem>>) attributes {dimension_semantics = [#tpu.dimension_semantics<parallel>, #tpu.dimension_semantics<parallel>], iteration_bounds = array<i64: 1, 1>, scalar_prefetch = 0 : i64, scratch_operands = 0 : i64, tpu.core_type = #tpu.core_type<tc>, window_params = [{transform_indices = @transform_0, window_bounds = array<i64: 16, 16>}, {transform_indices = @transform_1, window_bounds = array<i64: 16, 128>}, {transform_indices = @transform_2, window_bounds = array<i64: 1, 128>}, {transform_indices = @transform_3, window_bounds = array<i64: 16, 128>}]} {
    %c0 = arith.constant 0 : index
    %c0_0 = arith.constant 0 : index
    %0 = vector.load %arg2[%c0, %c0_0] : memref<16x16xf32, #tpu.memory_space<vmem>>, vector<16x16xf32>
    %c0_1 = arith.constant 0 : index
    %c0_2 = arith.constant 0 : index
    %1 = vector.load %arg3[%c0_1, %c0_2] : memref<16x128xf32, #tpu.memory_space<vmem>>, vector<16x128xf32>
    %cst = arith.constant dense<0.000000e+00> : vector<16x128xf32>
    %2 = tpu.matmul %0, %1, %cst {dimension_numbers = #tpu.dot_dimension_numbers<[1], [0], [0], [1], [0, 0, 1, 1], [], []>} : vector<16x16xf32>, vector<16x128xf32>, vector<16x128xf32> -> vector<16x128xf32>
    %c0_3 = arith.constant 0 : index
    %c0_4 = arith.constant 0 : index
    %3 = vector.load %arg4[%c0_3, %c0_4] : memref<1x128xf32, #tpu.memory_space<vmem>>, vector<1x128xf32>
    %4 = vector.broadcast %3 : vector<1x128xf32> to vector<16x128xf32>
    %5 = arith.addf %2, %4 : vector<16x128xf32>
    %6 = math.tanh %5 : vector<16x128xf32>
    %c0_5 = arith.constant 0 : index
    %c0_6 = arith.constant 0 : index
    %7 = vector.load %arg5[%c0_5, %c0_6] : memref<16x128xf32, #tpu.memory_space<vmem>>, vector<16x128xf32>
    tpu.vector_store %arg5[%c0_5, %c0_6], %6 {strides = array<i32>} : memref<16x128xf32, #tpu.memory_space<vmem>>, vector<16x128xf32>,
    return
  }
  func.func @transform_0(%arg0: i32, %arg1: i32) -> (i32, i32) {
    %c0_i32 = arith.constant 0 : i32
    %c0_i32_0 = arith.constant 0 : i32
    return %arg0, %c0_i32 : i32, i32
  }
  func.func @transform_1(%arg0: i32, %arg1: i32) -> (i32, i32) {
    %c0_i32 = arith.constant 0 : i32
    %c0_i32_0 = arith.constant 0 : i32
    return %c0_i32, %arg1 : i32, i32
  }
  func.func @transform_2(%arg0: i32, %arg1: i32) -> (i32, i32) {
    %c0_i32 = arith.constant 0 : i32
    %c0_i32_0 = arith.constant 0 : i32
    return %c0_i32, %arg1 : i32, i32
  }
  func.func @transform_3(%arg0: i32, %arg1: i32) -> (i32, i32) {
    %c0_i32 = arith.constant 0 : i32
    return %arg0, %arg1 : i32, i32
  }
}

</mosaic_0001>

<bundles_post_ra>
// kernel: tpu_custom_call.1
= control target key start
LH: loop header
LB: loop body
LE: loop exit
PB: predicated region body
PF: predicated region fallthrough
CT: control target
= control target key end

     0   :  { %8 = vsyncpa [#allocation3], 0  ;;  %s247_s0 = inlined_call_operand.hbm [shape: f32[16,16], index: 0, kind: input, shape index: {}]   ;;  %s248_s1 = inlined_call_operand.hbm [shape: f32[16,128], index: 1, kind: input, shape index: {}]   ;;  %s249_s2 = inlined_call_operand.vmem [shape: f32[1,128], index: 2, kind: input, shape index: {}]   ;;  %s250_s3 = inlined_call_operand.hbm [shape: f32[16,128], index: 3, kind: output, shape index: {}]  }
   0x1   :  { %9 = vsyncpa [#allocation6], 0 }
   0x2   :  { %10 = vsyncpa [#allocation4], 0  ;;  %s15_s14 = sshll.u32 %s247_s0, 4  ;;  %s201_s15 = smov [#allocation2]   ;;  %s16_s14 = int_to_ptr.hbm [resolvable:$true] %s15_s14 }
   0x3   :  { %s17_s16 = sshll.u32 %s201_s15, 4  ;;  %s28_s19 = sshll.u32 %s248_s1, 4  ;;  %s18_s16 = int_to_ptr.vmem [resolvable:$true] %s17_s16  ;;  %s29_s19 = int_to_ptr.hbm [resolvable:$true] %s28_s19 }
   0x4   :  { %s202_s20 = smov 128   ;;  %s203_s21 = smov 8  }
   0x5   :  { %23 = dma.hbm_to_vmem [thread:$0]  %s16_s14, 256, %s18_s16, [#allocation3], %s202_s20, %s202_s20, %s203_s21  }
   0x6   :  { %s204_s22 = smov [#allocation5]  }
   0x7   :  { %s30_s23 = sshll.u32 %s204_s22, 4  ;;  %s31_s23 = int_to_ptr.vmem [resolvable:$true] %s30_s23 }
   0x8   :  { %36 = dma.hbm_to_vmem [thread:$0]  %s29_s19, 256, %s31_s23, [#allocation6], %s202_s20, %s202_s20, %s203_s21  }
   0x9   :  { %195 = dma.done.wait [#allocation3], 256  }
   0xa   :  { %196 = vsyncadd [#allocation3], 4294967040 }
   0xb   :  { %197 = dma.done.wait [#allocation6], 256  }
   0xc   :  { %198 = vsyncadd [#allocation6], 4294967040  ;;  %v50_v0 = vld [vmem:[#allocation5 + $0x8] sm:$0xff]  ;;  %v49_v1 = vld [vmem:[#allocation5] sm:$0xff]  ;;  %vm55_vm0 = vcmask 130048   ;;  %s205_s24 = smov [#allocation7]  }
   0xd   :  { %76 = vmatpush.msra.mxu0 %v50_v0  ;;  %111 = vmatpush.msra.mxu1 %v50_v0  ;;  %v47_v2 = vld [vmem:[#allocation2] sm:$0xff]  ;;  %v48_v3 = vld [vmem:[#allocation2 + $0x8] sm:$0xff]  ;;  %s93_s25 = sshll.u32 %s205_s24, 4  ;;  %s95_s28 = sshll.u32 %s250_s3, 4  ;;  %s94_s25 = int_to_ptr.vmem [resolvable:$true] %s93_s25  ;;  %s96_s28 = int_to_ptr.hbm [resolvable:$true] %s95_s28 }
   0xe   :  { %v118_v4 = vld [vmem:[%s249_s2] ss:$0 sm:$0xff] }
   0xf   :  { %77 = vmatpush.msra.mxu0 %v49_v1  ;;  %112 = vmatpush.msra.mxu1 %v49_v1 }
  0x10   :  { %109 = vmatmul.msk.f32.vlgmr.msra.gmra.mxu0 %vm55_vm0, %v47_v2  ;;  %110 = vmatmul.msk.f32.vlgmr.msra.gmra.mxu1 %vm55_vm0, %v48_v3 }
  0x8d   :  { %v79_v5 = vpop.f32.mrf.mxu0  ;;  %v82_v6 = vpop.f32.mrf.mxu1 }
  0x8e   :  { %v80_v7 = vadd.f32 %v118_v4, %v79_v5  ;;  %v83_v8 = vadd.f32 %v118_v4, %v82_v6 }
  0x90   :  { %119 = vtanh.f32 %v80_v7 }
  0x91   :  { %121 = vtanh.f32 %v83_v8 }
  0x96   :  { %v120_v9 = vpop.eup %119 }
  0x97   :  { %v122_v10 = vpop.eup %121  ;;  %87 = vst [vmem:[#allocation7] sm:$0xff] %v120_v9 }
  0x98   :  { %88 = vst [vmem:[#allocation7 + $0x8] sm:$0xff] %v122_v10 }
  0x99   :  { %101 = dma.vmem_to_hbm [thread:$0]  %s94_s25, 256, %s96_s28, [#allocation4], %s202_s20, %s202_s20, %s203_s21  }
  0x9a   :  { %199 = dma.done.wait [#allocation4], 256  }
  0x9b   :  { %200 = vsyncadd [#allocation4], 4294967040 }
  0x9c   :  { %106 = vsyncpa [#allocation3], 1 }
  0x9d   :  { %107 = vsyncpa [#allocation6], 1 }
  0x9e   :  { %108 = vsyncpa [#allocation4], 1 }

</bundles_post_ra>
